<compile_context>
chip_gen: v7x
topology: tpu7x:2x2x1
jax: 0.10.0
libtpu: 0.0.40
codegen_flags: <defaults>
</compile_context>

<pallas_src>
import jax
import jax.numpy as jnp
from jax.experimental import pallas as pl
from jax.experimental.pallas import tpu as pltpu


_LANE = 128     # feature (lane) alignment
_SUBLANE = 8    # batch (sublane) alignment


def _round_up(x, m):
    return ((x + m - 1) // m) * m


def _resblock_kernel(x_ref,
                     w1_ref, b1_ref,
                     w2a_ref, b2a_ref,
                     w2b_ref, b2b_ref,
                     o_ref):
    """One batch tile of: out = x + max(branch_a(x), branch_b(x)).

    branch(x) = relu(x @ W1 + b1) @ W2 + b2.  The two first-layer matmuls are
    fused into a single (tile_b, 2N) dot (w1_ref = [W1a.T | W1b.T]).  Matmul
    operands are bf16 (MXU native); accumulation + all elementwise math in f32
    (v5e's VPU has no bf16 path).
    """
    n = w2a_ref.shape[0]                       # padded feature dim (static)

    x = x_ref[...]                             # (tile_b, N) f32
    x_bf16 = x.astype(jnp.bfloat16)

    # Fused first layer for both branches: (tile_b, 2N), f32 accumulation.
    h = jnp.dot(x_bf16, w1_ref[...], preferred_element_type=jnp.float32)
    h = jnp.maximum(h + b1_ref[...], 0.0)      # bias + ReLU in f32

    h1 = h[:, :n].astype(jnp.bfloat16)         # static, lane-aligned slices
    h2 = h[:, n:].astype(jnp.bfloat16)

    o1 = jnp.dot(h1, w2a_ref[...], preferred_element_type=jnp.float32) + b2a_ref[...]
    o2 = jnp.dot(h2, w2b_ref[...], preferred_element_type=jnp.float32) + b2b_ref[...]

    # elementwise max of the two branches + residual (f32).
    o_ref[...] = (x + jnp.maximum(o1, o2)).astype(o_ref.dtype)


def pack_params(params, num_neurons):
    """One-time repack of PyTorch-layout params (do NOT call per step)."""
    n = num_neurons
    n_pad = _round_up(n, _LANE)

    def pad_w(w_t):          # (n, n) transposed weight -> (n_pad, n_pad)
        return jnp.zeros((n_pad, n_pad), jnp.float32).at[:n, :n].set(w_t)

    def pad_b(b):            # (n,) -> (1, n_pad)
        return jnp.zeros((1, n_pad), jnp.float32).at[0, :n].set(b)

    w1a = pad_w(params["w1a"].T)
    w1b = pad_w(params["w1b"].T)
    w2a = pad_w(params["w2a"].T)
    w2b = pad_w(params["w2b"].T)

    return {
        "n": n,
        "n_padded": n_pad,
        # fused first layer: [W1a.T | W1b.T]  -> (n_pad, 2*n_pad), bf16
        "w1": jnp.concatenate([w1a, w1b], axis=1).astype(jnp.bfloat16),
        "b1": jnp.concatenate([pad_b(params["b1a"]), pad_b(params["b1b"])], axis=1),
        "w2a": w2a.astype(jnp.bfloat16),
        "b2a": pad_b(params["b2a"]),
        "w2b": w2b.astype(jnp.bfloat16),
        "b2b": pad_b(params["b2b"]),
    }


def max_parallel_res_block(x, packed, *, tile_b=256, vmem_limit_bytes=None):
    """x: (B, N) f32.  packed: output of pack_params().  Returns (B, N) f32."""
    B, n = x.shape
    assert n == packed["n"], "feature dim mismatch with packed params"
    n_pad = packed["n_padded"]

    # Real batch tile (sublane-aligned, capped by the batch itself) so the grid
    # has multiple steps -> DMA/compute pipelining + v7x dual-TC sharding.
    tile_b = min(_round_up(tile_b, _SUBLANE), _round_up(B, _SUBLANE))
    b_pad = _round_up(B, tile_b)               # no silently-dropped tail tiles
    num_tiles = b_pad // tile_b

    # Zero-pad activations to the aligned compute shape (sliced back below).
    xp = x
    if (b_pad, n_pad) != (B, n):
        xp = jnp.zeros((b_pad, n_pad), x.dtype).at[:B, :n].set(x)

    x_spec = pl.BlockSpec((tile_b, n_pad), lambda i: (i, 0))
    # Constant-index weights/biases: keep resident with a single VMEM buffer
    # (halves weight VMEM footprint; matters on v7x's 64 MiB VMEM).
    w1_spec = pl.BlockSpec((n_pad, 2 * n_pad), lambda i: (0, 0),
                           pipeline_mode=pl.Buffered(1))
    b1_spec = pl.BlockSpec((1, 2 * n_pad), lambda i: (0, 0),
                           pipeline_mode=pl.Buffered(1))
    w2_spec = pl.BlockSpec((n_pad, n_pad), lambda i: (0, 0),
                           pipeline_mode=pl.Buffered(1))
    b2_spec = pl.BlockSpec((1, n_pad), lambda i: (0, 0),
                           pipeline_mode=pl.Buffered(1))

    flops = 8 * b_pad * n_pad * n_pad          # one (tb,N)x(N,2N) + two (tb,N)x(N,N)
    bytes_accessed = (2 * b_pad * n_pad * 4    # x in + out (f32)
                      + 4 * n_pad * n_pad * 2  # bf16 weights
                      + 4 * n_pad * 4)         # f32 biases

    # TODO(synk): nn.Dropout (dropout>0) not implemented; module built with dropout=0.0.
    # TODO(synk): for very large N on v7x, add an inner K/N weight tiling
    # (emit_pipeline / extra grid axis) instead of fully-resident weights.
    out_padded = pl.pallas_call(
        _resblock_kernel,
        out_shape=jax.ShapeDtypeStruct((b_pad, n_pad), x.dtype),
        grid_spec=pltpu.PrefetchScalarGridSpec(
            num_scalar_prefetch=0,
            grid=(num_tiles,),
            in_specs=[x_spec,
                      w1_spec, b1_spec,
                      w2_spec, b2_spec,
                      w2_spec, b2_spec],
            out_specs=x_spec,
        ),
        compiler_params=pltpu.CompilerParams(
            dimension_semantics=("parallel",),
            vmem_limit_bytes=vmem_limit_bytes),   # raise for large N on v5e
        cost_estimate=pl.CostEstimate(
            flops=flops, transcendentals=0, bytes_accessed=bytes_accessed),
    )(xp, packed["w1"], packed["b1"],
      packed["w2a"], packed["b2a"],
      packed["w2b"], packed["b2b"])

    if (b_pad, n_pad) != (B, n):
        out_padded = out_padded[:B, :n]
    return out_padded


def _init_params(key, num_neurons):
    """Deterministic init mimicking PyTorch's U(-1/sqrt(in), 1/sqrt(in))."""
    bound = 1.0 / jnp.sqrt(float(num_neurons))
    keys = jax.random.split(key, 8)
    names = ["w1a", "b1a", "w2a", "b2a", "w1b", "b1b", "w2b", "b2b"]
    params = {}
    for k, name in zip(keys, names):
        shape = (num_neurons, num_neurons) if name.startswith("w") else (num_neurons,)
        params[name] = jax.random.uniform(
            k, shape, dtype=jnp.float32, minval=-bound, maxval=bound)
    return params


def _reference(x, p):
    def branch(x, w1, b1, w2, b2):
        h = jnp.maximum(x @ w1.T + b1, 0.0)
        return h @ w2.T + b2
    o1 = branch(x, p["w1a"], p["b1a"], p["w2a"], p["b2a"])
    o2 = branch(x, p["w1b"], p["b1b"], p["w2b"], p["b2b"])
    return x + jnp.maximum(o1, o2)


def _run_case(key, B, N, tile_b):
    k_x, k_p = jax.random.split(key)
    x = jax.random.normal(k_x, (B, N), dtype=jnp.float32)
    params = _init_params(k_p, N)
    packed = pack_params(params, N)            # one-time repack (outside the step)

    out = max_parallel_res_block(x, packed, tile_b=tile_b)
    out = jax.block_until_ready(out)

    ref = _reference(x, params)
    assert out.shape == (B, N)
    # bf16 MXU operands with f32 accumulation: loosened tolerance vs f32 ref.
    assert jnp.allclose(out, ref, atol=3e-2, rtol=3e-2), (
        f"mismatch vs reference (max abs err {jnp.max(jnp.abs(out - ref)):.3e})")


if __name__ == "__main__":
    key = jax.random.PRNGKey(0)
    k1, k2 = jax.random.split(key)
    # tiny shape (exercises feature padding 32 -> 128, single grid step)
    _run_case(k1, B=8, N=32, tile_b=256)
    # small multi-tile shape (batch padding 80 -> 96, 3 pipelined grid steps)
    _run_case(k2, B=80, N=128, tile_b=32)
    print("KERNEL_OK")
</pallas_src>

<mosaic_0001>
module attributes {stable_mosaic.version = 11 : i64} {
  func.func @_resblock_kernel(%arg0: i32, %arg1: memref<8x128xf32, #tpu.memory_space<vmem>>, %arg2: memref<128x256xbf16, #tpu.memory_space<vmem>>, %arg3: memref<1x256xf32, #tpu.memory_space<vmem>>, %arg4: memref<128x128xbf16, #tpu.memory_space<vmem>>, %arg5: memref<1x128xf32, #tpu.memory_space<vmem>>, %arg6: memref<128x128xbf16, #tpu.memory_space<vmem>>, %arg7: memref<1x128xf32, #tpu.memory_space<vmem>>, %arg8: memref<8x128xf32, #tpu.memory_space<vmem>>) attributes {dimension_semantics = [#tpu.dimension_semantics<parallel>], iteration_bounds = array<i64: 1>, scalar_prefetch = 0 : i64, scratch_operands = 0 : i64, tpu.core_type = #tpu.core_type<tc>, window_params = [{transform_indices = @transform_0, window_bounds = array<i64: 8, 128>}, {pipeline_mode = #tpu.pipeline_mode<synchronous>, transform_indices = @transform_1, window_bounds = array<i64: 128, 256>}, {pipeline_mode = #tpu.pipeline_mode<synchronous>, transform_indices = @transform_2, window_bounds = array<i64: 1, 256>}, {pipeline_mode = #tpu.pipeline_mode<synchronous>, transform_indices = @transform_3, window_bounds = array<i64: 128, 128>}, {pipeline_mode = #tpu.pipeline_mode<synchronous>, transform_indices = @transform_4, window_bounds = array<i64: 1, 128>}, {pipeline_mode = #tpu.pipeline_mode<synchronous>, transform_indices = @transform_5, window_bounds = array<i64: 128, 128>}, {pipeline_mode = #tpu.pipeline_mode<synchronous>, transform_indices = @transform_6, window_bounds = array<i64: 1, 128>}, {transform_indices = @transform_7, window_bounds = array<i64: 8, 128>}]} {
    %c0 = arith.constant 0 : index
    %c0_0 = arith.constant 0 : index
    %0 = vector.load %arg1[%c0, %c0_0] : memref<8x128xf32, #tpu.memory_space<vmem>>, vector<8x128xf32>
    %1 = arith.truncf %0 : vector<8x128xf32> to vector<8x128xbf16>
    %c0_1 = arith.constant 0 : index
    %c0_2 = arith.constant 0 : index
    %2 = vector.load %arg2[%c0_1, %c0_2] : memref<128x256xbf16, #tpu.memory_space<vmem>>, vector<128x256xbf16>
    %cst = arith.constant dense<0.000000e+00> : vector<8x256xf32>
    %3 = tpu.matmul %1, %2, %cst {dimension_numbers = #tpu.dot_dimension_numbers<[1], [0], [0], [1], [0, 0, 1, 1], [], []>} : vector<8x128xbf16>, vector<128x256xbf16>, vector<8x256xf32> -> vector<8x256xf32>
    %c0_3 = arith.constant 0 : index
    %c0_4 = arith.constant 0 : index
    %4 = vector.load %arg3[%c0_3, %c0_4] : memref<1x256xf32, #tpu.memory_space<vmem>>, vector<1x256xf32>
    %5 = vector.broadcast %4 : vector<1x256xf32> to vector<8x256xf32>
    %6 = arith.addf %3, %5 : vector<8x256xf32>
    %cst_5 = arith.constant 0.000000e+00 : f32
    %7 = vector.broadcast %cst_5 : f32 to vector<8x256xf32>
    %8 = arith.maximumf %6, %7 : vector<8x256xf32>
    %9 = vector.extract_strided_slice %8 {offsets = [0, 0], sizes = [8, 128], strides = [1, 1]} : vector<8x256xf32> to vector<8x128xf32>
    %10 = arith.truncf %9 : vector<8x128xf32> to vector<8x128xbf16>
    %11 = vector.extract_strided_slice %8 {offsets = [0, 128], sizes = [8, 128], strides = [1, 1]} : vector<8x256xf32> to vector<8x128xf32>
    %12 = arith.truncf %11 : vector<8x128xf32> to vector<8x128xbf16>
    %c0_6 = arith.constant 0 : index
    %c0_7 = arith.constant 0 : index
    %13 = vector.load %arg4[%c0_6, %c0_7] : memref<128x128xbf16, #tpu.memory_space<vmem>>, vector<128x128xbf16>
    %cst_8 = arith.constant dense<0.000000e+00> : vector<8x128xf32>
    %14 = tpu.matmul %10, %13, %cst_8 {dimension_numbers = #tpu.dot_dimension_numbers<[1], [0], [0], [1], [0, 0, 1, 1], [], []>} : vector<8x128xbf16>, vector<128x128xbf16>, vector<8x128xf32> -> vector<8x128xf32>
    %c0_9 = arith.constant 0 : index
    %c0_10 = arith.constant 0 : index
    %15 = vector.load %arg5[%c0_9, %c0_10] : memref<1x128xf32, #tpu.memory_space<vmem>>, vector<1x128xf32>
    %16 = vector.broadcast %15 : vector<1x128xf32> to vector<8x128xf32>
    %17 = arith.addf %14, %16 : vector<8x128xf32>
    %c0_11 = arith.constant 0 : index
    %c0_12 = arith.constant 0 : index
    %18 = vector.load %arg6[%c0_11, %c0_12] : memref<128x128xbf16, #tpu.memory_space<vmem>>, vector<128x128xbf16>
    %cst_13 = arith.constant dense<0.000000e+00> : vector<8x128xf32>
    %19 = tpu.matmul %12, %18, %cst_13 {dimension_numbers = #tpu.dot_dimension_numbers<[1], [0], [0], [1], [0, 0, 1, 1], [], []>} : vector<8x128xbf16>, vector<128x128xbf16>, vector<8x128xf32> -> vector<8x128xf32>
    %c0_14 = arith.constant 0 : index
    %c0_15 = arith.constant 0 : index
    %20 = vector.load %arg7[%c0_14, %c0_15] : memref<1x128xf32, #tpu.memory_space<vmem>>, vector<1x128xf32>
    %21 = vector.broadcast %20 : vector<1x128xf32> to vector<8x128xf32>
    %22 = arith.addf %19, %21 : vector<8x128xf32>
    %23 = arith.maximumf %17, %22 : vector<8x128xf32>
    %24 = arith.addf %0, %23 : vector<8x128xf32>
    %c0_16 = arith.constant 0 : index
    %c0_17 = arith.constant 0 : index
    %25 = vector.load %arg8[%c0_16, %c0_17] : memref<8x128xf32, #tpu.memory_space<vmem>>, vector<8x128xf32>
    tpu.vector_store %arg8[%c0_16, %c0_17], %24 {strides = array<i32>} : memref<8x128xf32, #tpu.memory_space<vmem>>, vector<8x128xf32>,
    return
  }
  func.func @transform_0(%arg0: i32) -> (i32, i32) {
    %c0_i32 = arith.constant 0 : i32
    %c0_i32_0 = arith.constant 0 : i32
    return %arg0, %c0_i32 : i32, i32
  }
  func.func @transform_1(%arg0: i32) -> (i32, i32) {
    %c0_i32 = arith.constant 0 : i32
    %c0_i32_0 = arith.constant 0 : i32
    %c0_i32_1 = arith.constant 0 : i32
    return %c0_i32, %c0_i32_0 : i32, i32
  }
  func.func @transform_2(%arg0: i32) -> (i32, i32) {
    %c0_i32 = arith.constant 0 : i32
    %c0_i32_0 = arith.constant 0 : i32
    %c0_i32_1 = arith.constant 0 : i32
    return %c0_i32, %c0_i32_0 : i32, i32
  }
  func.func @transform_3(%arg0: i32) -> (i32, i32) {
    %c0_i32 = arith.constant 0 : i32
    %c0_i32_0 = arith.constant 0 : i32
    %c0_i32_1 = arith.constant 0 : i32
    return %c0_i32, %c0_i32_0 : i32, i32
  }
  func.func @transform_4(%arg0: i32) -> (i32, i32) {
    %c0_i32 = arith.constant 0 : i32
    %c0_i32_0 = arith.constant 0 : i32
    %c0_i32_1 = arith.constant 0 : i32
    return %c0_i32, %c0_i32_0 : i32, i32
  }
  func.func @transform_5(%arg0: i32) -> (i32, i32) {
    %c0_i32 = arith.constant 0 : i32
    %c0_i32_0 = arith.constant 0 : i32
    %c0_i32_1 = arith.constant 0 : i32
    return %c0_i32, %c0_i32_0 : i32, i32
  }
  func.func @transform_6(%arg0: i32) -> (i32, i32) {
    %c0_i32 = arith.constant 0 : i32
    %c0_i32_0 = arith.constant 0 : i32
    %c0_i32_1 = arith.constant 0 : i32
    return %c0_i32, %c0_i32_0 : i32, i32
  }
  func.func @transform_7(%arg0: i32) -> (i32, i32) {
    %c0_i32 = arith.constant 0 : i32
    %c0_i32_0 = arith.constant 0 : i32
    return %arg0, %c0_i32 : i32, i32
  }
}

</mosaic_0001>

<bundles_post_ra>
// kernel: tpu_custom_call.1
= control target key start
LH: loop header
LB: loop body
LE: loop exit
PB: predicated region body
PF: predicated region fallthrough
CT: control target
= control target key end

     0   :  { %12 = vsyncpa [#allocation3], 0  ;;  %s884_s0 = inlined_call_operand.hbm [shape: f32[8,128], index: 0, kind: input, shape index: {}]   ;;  %s885_s1 = inlined_call_operand.hbm [shape: bf16[128,256], index: 1, kind: input, shape index: {}]   ;;  %s886_s2 = inlined_call_operand.vmem [shape: f32[1,256], index: 2, kind: input, shape index: {}]   ;;  %s887_s3 = inlined_call_operand.hbm [shape: bf16[128,128], index: 3, kind: input, shape index: {}]   ;;  %s888_s4 = inlined_call_operand.vmem [shape: f32[1,128], index: 4, kind: input, shape index: {}]   ;;  %s889_s5 = inlined_call_operand.hbm [shape: bf16[128,128], index: 5, kind: input, shape index: {}]   ;;  %s890_s6 = inlined_call_operand.vmem [shape: f32[1,128], index: 6, kind: input, shape index: {}]   ;;  %s891_s7 = inlined_call_operand.hbm [shape: f32[8,128], index: 7, kind: output, shape index: {}]  }
   0x1   :  { %13 = vsyncpa [#allocation6], 0 }
   0x2   :  { %14 = vsyncpa [#allocation9], 0 }
   0x3   :  { %15 = vsyncpa [#allocation4], 0  ;;  %s740_s24 = smov [#allocation5]   ;;  %s622_s28 = scalar_lea.hbm %s885_s1, 2048 }
   0x4   :  { %s31_s25 = sshll.u32 %s740_s24, 4  ;;  %p623_p0 = scmp.ne.s32.totalorder %s885_s1, %s622_s28  ;;  %s32_s25 = int_to_ptr.vmem [resolvable:$true] %s31_s25 }
   0x5   :  { %p626_p1 = scmp.lt.u32.totalorder %s622_s28, %s885_s1 }
   0x7   :  { %p628_p2 = pnand %p626_p1, %p623_p0 }
   0x9   :  { %631 = shalt.err (!%p628_p2)
}
   0xa   :  { %s632_s10 = scalar_lea.vmem %s32_s25, 2048  ;;  %p637_p4 = scmp.lt.s32.totalorder %s32_s25, %s32_s25 }
   0xb   :  { %p633_p3 = scmp.ne.s32.totalorder %s32_s25, %s632_s10  ;;  %p638_p5 = scmp.lt.s32.totalorder %s632_s10, %s632_s10 }
   0xd   :  { %p639_p6 = por %p638_p5, %p637_p4 }
   0xf   :  { %p640_p7 = pnand %p639_p6, %p633_p3 }
  0x11   :  { %643 = shalt.err (!%p640_p7)
}
  0x12   :  { %s741_s11 = smov 128   ;;  %s742_s12 = smov 8  }
  0x13   :  { %37 = dma.hbm_to_vmem [thread:$0]  %s885_s1, 2048, %s32_s25, [#allocation6], %s741_s11, %s741_s11, %s742_s12  }
  0x14   :  { %s743_s15 = smov [#allocation2]   ;;  %s744_s17 = smov [#allocation7]  }
  0x15   :  { %s22_s16 = sshll.u32 %s743_s15, 4  ;;  %s45_s18 = sshll.u32 %s744_s17, 4  ;;  %s23_s16 = int_to_ptr.vmem [resolvable:$true] %s22_s16  ;;  %s46_s18 = int_to_ptr.vmem [resolvable:$true] %s45_s18 }
  0x16   :  { %s644_s21 = scalar_lea.hbm %s884_s0, 128 }
  0x17   :  { %p645_p8 = scmp.ne.s32.totalorder %s884_s0, %s644_s21  ;;  %p648_p9 = scmp.lt.u32.totalorder %s644_s21, %s884_s0 }
  0x19   :  { %p650_p10 = pnand %p648_p9, %p645_p8 }
  0x1b   :  { %653 = shalt.err (!%p650_p10)
}
  0x1c   :  { %s654_s1 = scalar_lea.vmem %s23_s16, 128  ;;  %p659_p12 = scmp.lt.s32.totalorder %s23_s16, %s23_s16 }
  0x1d   :  { %p655_p11 = scmp.ne.s32.totalorder %s23_s16, %s654_s1  ;;  %p660_p13 = scmp.lt.s32.totalorder %s654_s1, %s654_s1 }
  0x1f   :  { %p661_p0 = por %p660_p13, %p659_p12 }
  0x21   :  { %p662_p1 = pnand %p661_p0, %p655_p11 }
  0x23   :  { %665 = shalt.err (!%p662_p1)
}
  0x24   :  { %25 = dma.hbm_to_vmem [thread:$0]  %s884_s0, 128, %s23_s16, [#allocation3]  }
  0x25   :  { %s666_s30 = scalar_lea.hbm %s887_s3, 1024 }
  0x26   :  { %p667_p2 = scmp.ne.s32.totalorder %s887_s3, %s666_s30  ;;  %p670_p3 = scmp.lt.u32.totalorder %s666_s30, %s887_s3 }
  0x28   :  { %p672_p4 = pnand %p670_p3, %p667_p2 }
  0x2a   :  { %675 = shalt.err (!%p672_p4)
}
  0x2b   :  { %s676_s12 = scalar_lea.vmem %s46_s18, 1024  ;;  %p681_p6 = scmp.lt.s32.totalorder %s46_s18, %s46_s18 }
  0x2c   :  { %p677_p5 = scmp.ne.s32.totalorder %s46_s18, %s676_s12  ;;  %p682_p7 = scmp.lt.s32.totalorder %s676_s12, %s676_s12 }
  0x2e   :  { %p683_p8 = por %p682_p7, %p681_p6 }
  0x30   :  { %p684_p9 = pnand %p683_p8, %p677_p5 }
  0x32   :  { %687 = shalt.err (!%p684_p9)
}
  0x33   :  { %s745_s0 = smov 64   ;;  %s746_s13 = smov 4  }
  0x34   :  { %51 = dma.hbm_to_vmem [thread:$0]  %s887_s3, 1024, %s46_s18, [#allocation6], %s745_s0, %s745_s0, %s746_s13  }
  0x35   :  { %s747_s16 = smov [#allocation8]   ;;  %s688_s21 = scalar_lea.hbm %s889_s5, 1024 }
  0x36   :  { %s59_s17 = sshll.u32 %s747_s16, 4  ;;  %p689_p10 = scmp.ne.s32.totalorder %s889_s5, %s688_s21  ;;  %s60_s17 = int_to_ptr.vmem [resolvable:$true] %s59_s17 }
  0x37   :  { %p692_p11 = scmp.lt.u32.totalorder %s688_s21, %s889_s5 }
  0x39   :  { %p694_p12 = pnand %p692_p11, %p689_p10 }
  0x3b   :  { %697 = shalt.err (!%p694_p12)
}
  0x3c   :  { %s698_s1 = scalar_lea.vmem %s60_s17, 1024  ;;  %p703_p0 = scmp.lt.s32.totalorder %s60_s17, %s60_s17 }
  0x3d   :  { %p699_p13 = scmp.ne.s32.totalorder %s60_s17, %s698_s1  ;;  %p704_p1 = scmp.lt.s32.totalorder %s698_s1, %s698_s1 }
  0x3f   :  { %p705_p2 = por %p704_p1, %p703_p0 }
  0x41   :  { %p706_p3 = pnand %p705_p2, %p699_p13 }
  0x43   :  { %709 = shalt.err (!%p706_p3)
}
  0x44   :  { %65 = dma.hbm_to_vmem [thread:$0]  %s889_s5, 1024, %s60_s17, [#allocation9], %s745_s0, %s745_s0, %s746_s13  }
  0x45   :  { %732 = dma.done.wait [#allocation3], 128  }
  0x46   :  { %733 = vsyncadd [#allocation3], 4294967168 }
  0x47   :  { %734 = dma.done.wait [#allocation6], 3072  }
  0x48   :  { %735 = vsyncadd [#allocation6], 4294964224 }
  0x49   :  { %736 = dma.done.wait [#allocation9], 1024  }
  0x4a   :  { %737 = vsyncadd [#allocation9], 4294966272  ;;  %v748_v0 = vmov 0   ;;  %v749_v1 = vmov 0.0   ;;  %v582_v2 = vld [vmem:[#allocation5 + $0x4] ss:$8 sps:$4 sm:$0xff]   ;;  %v101_v36 = vlaneseq }
  0x4b   :  { %223 = vmatprep.mubr.bf16.mxu0 %v748_v0  ;;  %530 = vmatprep.subr.bf16.mxu1 %v749_v1  ;;  %v584_v3 = vld [vmem:[#allocation5] ss:$8 sps:$4 sm:$0xff]   ;;  %v585_v4 = vld [vmem:[#allocation5 + $0x14] ss:$8 sps:$4 sm:$0xff]   ;;  %v587_v5 = vld [vmem:[#allocation5 + $0x10] ss:$8 sps:$4 sm:$0xff]  }
  0x4c   :  { %191 = vmatprep.subr.bf16.mxu0 %v582_v2  ;;  %v588_v6 = vld [vmem:[#allocation5 + $0x24] ss:$8 sps:$4 sm:$0xff]   ;;  %v590_v7 = vld [vmem:[#allocation5 + $0x20] ss:$8 sps:$4 sm:$0xff]   ;;  %v591_v8 = vld [vmem:[#allocation5 + $0x34] ss:$8 sps:$4 sm:$0xff]  }
  0x4d   :  { %192 = vmatpush1.bf16.msra.mxu0 %v584_v3  ;;  %v593_v9 = vld [vmem:[#allocation5 + $0x30] ss:$8 sps:$4 sm:$0xff]   ;;  %v606_v10 = vld [vmem:[#allocation7] sm:$0xff]   ;;  %v608_v12 = vld [vmem:[#allocation7 + $0x8] sm:$0xff]   ;;  %vm750_vm0 = vmmov 0   ;;  %v102_v37 = vshrl.u32 %v101_v36, 7 }
  0x4e   :  { %193 = vmatprep.subr.bf16.mxu0 %v585_v4  ;;  %v594_v11 = vld [vmem:[#allocation5 + $0x44] ss:$8 sps:$4 sm:$0xff]   ;;  %531 = vmatpush3.bf16.msra.mxu1 %v606_v10  ;;  %v596_v13 = vld [vmem:[#allocation5 + $0x40] ss:$8 sps:$4 sm:$0xff]   ;;  %v597_v14 = vld [vmem:[#allocation5 + $0x54] ss:$8 sps:$4 sm:$0xff]  }
  0x4f   :  { %532 = vmatprep.subr.bf16.mxu1 %v749_v1  ;;  %v610_v15 = vld [vmem:[#allocation7 + $0x10] sm:$0xff]   ;;  %v600_v17 = vld [vmem:[#allocation5 + $0x64] ss:$8 sps:$4 sm:$0xff]   ;;  %v602_v18 = vld [vmem:[#allocation5 + $0x60] ss:$8 sps:$4 sm:$0xff]   ;;  %546 = vmatprep.mubr.msk.bf16.mxu1 %vm750_vm0, %v749_v1  ;;  %v103_v38 = vsub.s32 0, %v102_v37 }
  0x50   :  { %v599_v16 = vld [vmem:[#allocation5 + $0x50] ss:$8 sps:$4 sm:$0xff]   ;;  %v603_v20 = vld [vmem:[#allocation5 + $0x74] ss:$8 sps:$4 sm:$0xff]   ;;  %v614_v21 = vld [vmem:[#allocation7 + $0x20] sm:$0xff]   ;;  %v107_v40 = vsub.s32 1, %v102_v37 }
  0x51   :  { %194 = vmatpush1.bf16.msra.mxu0 %v587_v5  ;;  %v612_v19 = vld [vmem:[#allocation7 + $0x18] sm:$0xff]   ;;  %v616_v24 = vld [vmem:[#allocation7 + $0x28] sm:$0xff]   ;;  %v607_v26 = vld [vmem:[#allocation8] sm:$0xff]   ;;  %s751_s30 = smov [#allocation10]  }
  0x52   :  { %195 = vmatprep.subr.bf16.mxu0 %v588_v6  ;;  %533 = vmatpush3.bf16.msra.mxu1 %v608_v12  ;;  %v605_v22 = vld [vmem:[#allocation5 + $0x70] ss:$8 sps:$4 sm:$0xff]   ;;  %v609_v27 = vld [vmem:[#allocation8 + $0x8] sm:$0xff]   ;;  %v615_v30 = vld [vmem:[#allocation8 + $0x20] sm:$0xff]   ;;  %s467_s8 = sshll.u32 %s751_s30, 4  ;;  %s468_s8 = int_to_ptr.vmem [resolvable:$true] %s467_s8 }
  0x53   :  { %534 = vmatprep.subr.bf16.mxu1 %v749_v1  ;;  %v845_v23 = vld [vmem:[#allocation2] sm:$0xff]  ;;  %v611_v28 = vld [vmem:[#allocation8 + $0x10] sm:$0xff]   ;;  %v617_v31 = vld [vmem:[#allocation8 + $0x28] sm:$0xff]   ;;  %p715_p5 = scmp.lt.s32.totalorder %s468_s8, %s468_s8 }
  0x54   :  { %v82_v25 = vpack.c.bf16 %v845_v23, %v845_v23  ;;  %v613_v29 = vld [vmem:[#allocation8 + $0x18] sm:$0xff]   ;;  %v618_v32 = vld [vmem:[#allocation7 + $0x30] sm:$0xff]  }
  0x55   :  { %196 = vmatpush1.bf16.msra.mxu0 %v590_v7  ;;  %v619_v33 = vld [vmem:[#allocation8 + $0x30] sm:$0xff]   ;;  %v620_v34 = vld [vmem:[#allocation7 + $0x38] sm:$0xff]  }
  0x56   :  { %197 = vmatprep.subr.bf16.mxu0 %v591_v8  ;;  %535 = vmatpush3.bf16.msra.mxu1 %v610_v15  ;;  %v621_v35 = vld [vmem:[#allocation8 + $0x38] sm:$0xff]  }
  0x57   :  { %536 = vmatprep.subr.bf16.mxu1 %v749_v1  ;;  %v99_v39 = vld [vmem:[%s886_s2] sm:$0x3] }
  0x58   :  { %v104_v41 = vrot.slane %v99_v39, %v103_v38  ;;  %v108_v42 = vrot.slane %v99_v39, %v107_v40  ;;  %v494_v53 = vld [vmem:[%s888_s4] ss:$0 sm:$0xff]  ;;  %s710_s4 = scalar_lea.vmem %s468_s8, 128 }
  0x59   :  { %198 = vmatpush1.bf16.msra.mxu0 %v593_v9  ;;  %v503_v54 = vld [vmem:[%s890_s6] ss:$0 sm:$0xff]  ;;  %p711_p4 = scmp.ne.s32.totalorder %s468_s8, %s710_s4  ;;  %p716_p6 = scmp.lt.s32.totalorder %s710_s4, %s710_s4 }
  0x5a   :  { %199 = vmatprep.subr.bf16.mxu0 %v594_v11  ;;  %537 = vmatpush3.bf16.msra.mxu1 %v612_v19 }
  0x5b   :  { %538 = vmatprep.subr.bf16.mxu1 %v749_v1  ;;  %p717_p7 = por %p716_p6, %p715_p5 }
  0x5d   :  { %200 = vmatpush1.bf16.msra.mxu0 %v596_v13  ;;  %p718_p8 = pnand %p717_p7, %p711_p4 }
  0x5e   :  { %201 = vmatprep.subr.bf16.mxu0 %v597_v14  ;;  %539 = vmatpush3.bf16.msra.mxu1 %v614_v21 }
  0x5f   :  { %540 = vmatprep.subr.bf16.mxu1 %v749_v1 }
  0x61   :  { %202 = vmatpush1.bf16.msra.mxu0 %v599_v16 }
  0x62   :  { %203 = vmatprep.subr.bf16.mxu0 %v600_v17  ;;  %541 = vmatpush3.bf16.msra.mxu1 %v616_v24 }
  0x63   :  { %542 = vmatprep.subr.bf16.mxu1 %v749_v1 }
  0x65   :  { %204 = vmatpush1.bf16.msra.mxu0 %v602_v18 }
  0x66   :  { %205 = vmatprep.subr.bf16.mxu0 %v603_v20  ;;  %543 = vmatpush3.bf16.msra.mxu1 %v618_v32 }
  0x67   :  { %544 = vmatprep.subr.bf16.mxu1 %v749_v1 }
  0x69   :  { %206 = vmatpush1.bf16.msra.mxu0 %v605_v22 }
  0x6a   :  { %550 = vmatprep.subr.bf16.mxu0 %v749_v1  ;;  %545 = vmatpush3.bf16.msra.mxu1 %v620_v34 }
  0x6c   :  { %224 = vmatmul.mubr.bf16.vlgmr.msra.gmra.mrb[0].mxu0 %v82_v25 }
  0x6d   :  { %551 = vmatpush3.bf16.msra.mxu0 %v607_v26  ;;  %566 = vmatprep.mubr.msk.bf16.mxu0 %vm750_vm0, %v749_v1 }
  0x6e   :  { %552 = vmatprep.subr.bf16.mxu0 %v749_v1 }
  0x71   :  { %553 = vmatpush3.bf16.msra.mxu0 %v609_v27 }
  0x72   :  { %554 = vmatprep.subr.bf16.mxu0 %v749_v1 }
  0x75   :  { %555 = vmatpush3.bf16.msra.mxu0 %v611_v28 }
  0x76   :  { %556 = vmatprep.subr.bf16.mxu0 %v749_v1 }
  0x79   :  { %557 = vmatpush3.bf16.msra.mxu0 %v613_v29 }
  0x7a   :  { %558 = vmatprep.subr.bf16.mxu0 %v749_v1 }
  0x7d   :  { %559 = vmatpush3.bf16.msra.mxu0 %v615_v30 }
  0x7e   :  { %560 = vmatprep.subr.bf16.mxu0 %v749_v1 }
  0x81   :  { %561 = vmatpush3.bf16.msra.mxu0 %v617_v31 }
  0x82   :  { %562 = vmatprep.subr.bf16.mxu0 %v749_v1 }
  0x85   :  { %563 = vmatpush3.bf16.msra.mxu0 %v619_v33 }
  0x86   :  { %564 = vmatprep.subr.bf16.mxu0 %v749_v1 }
  0x89   :  { %565 = vmatpush3.bf16.msra.mxu0 %v621_v35 }
 0x13f   :  { %v225_v43 = vpop.f32.mrb[0].mxu0 }
 0x140   :  { %v226_v44 = vadd.f32 %v225_v43, %v104_v41  ;;  %v227_v45 = vpop.f32.mrb[1].mxu0 }
 0x141   :  { %v228_v46 = vadd.f32 %v227_v45, %v108_v42  ;;  %v229_v47 = vpop.f32.mrb[2].mxu0 }
 0x142   :  { %v232_v48 = vmax.f32 %v226_v44, 0.0  ;;  %v230_v49 = vpop.f32.mrb[3].mxu0 }
 0x143   :  { %v233_v50 = vmax.f32 %v228_v46, 0.0 }
 0x144   :  { %v234_v51 = vpack.c.bf16 %v232_v48, %v232_v48 }
 0x145   :  { %v235_v52 = vpack.c.bf16 %v233_v50, %v233_v50 }
 0x146   :  { %547 = vmatmul.mubr.bf16.vlgmr.msra.gmra.mrb[0].mxu1 %v234_v51 }
 0x147   :  { %567 = vmatmul.mubr.bf16.vlgmr.msra.gmra.mrb[4].mxu0 %v235_v52 }
 0x219   :  { %v341_v55 = vpop.f32.mrb[0].mxu1 }
 0x21a   :  { %v342_v56 = vadd.f32 %v494_v53, %v341_v55  ;;  %v548_v57 = vpop.f32.mrb[1].mxu1  ;;  %v452_v58 = vpop.f32.mrb[4].mxu0 }
 0x21b   :  { %v453_v59 = vadd.f32 %v503_v54, %v452_v58  ;;  %v344_v60 = vpop.f32.mrb[2].mxu1  ;;  %v568_v61 = vpop.f32.mrb[5].mxu0 }
 0x21c   :  { %v549_v62 = vpop.f32.mrb[3].mxu1  ;;  %v455_v63 = vpop.f32.mrb[6].mxu0 }
 0x21d   :  { %v458_v0 = vmax.f32 %v342_v56, %v453_v59  ;;  %v569_v1 = vpop.f32.mrb[7].mxu0 }
 0x21f   :  { %v459_v2 = vadd.f32 %v458_v0, %v845_v23 }
 0x221   :  { %460 = vst [vmem:[#allocation10] sm:$0xff] %v459_v2 }
 0x222   :  { %721 = shalt.err (!%p718_p8)
}
 0x223   :  { %s722_s10 = scalar_lea.hbm %s891_s7, 128 }
 0x224   :  { %p723_p9 = scmp.ne.s32.totalorder %s891_s7, %s722_s10  ;;  %p726_p10 = scmp.lt.u32.totalorder %s722_s10, %s891_s7 }
 0x226   :  { %p728_p11 = pnand %p726_p10, %p723_p9 }
 0x228   :  { %731 = shalt.err (!%p728_p11)
}
 0x229   :  { %470 = dma.vmem_to_hbm [thread:$0]  %s468_s8, 128, %s891_s7, [#allocation4]  }
 0x22a   :  { %738 = dma.done.wait [#allocation4], 128  }
 0x22b   :  { %739 = vsyncadd [#allocation4], 4294967168 }
 0x22c   :  { %474 = vsyncpa [#allocation3], 1 }
 0x22d   :  { %475 = vsyncpa [#allocation6], 1 }
 0x22e   :  { %476 = vsyncpa [#allocation9], 1 }
 0x22f   :  { %477 = vsyncpa [#allocation4], 1 }

</bundles_post_ra>
